<compile_context>
chip_gen: v5e
topology: v5e:2x2
jax: 0.10.0
libtpu: 0.0.40
codegen_flags: <defaults>
</compile_context>

<pallas_src>
import functools
import jax
import jax.numpy as jnp
from jax.experimental import pallas as pl
from jax.experimental.pallas import tpu as pltpu


# ----------------------------------------------------------------------------
# Pallas kernels
# ----------------------------------------------------------------------------
def _conv3x3_kernel(x_ref, w_ref, b_ref, o_ref, *, shifts, n_out, act, alpha):
    """3x3 conv as 9 shifted matmuls, f32 accumulation, fused bias + act.

    x_ref : (1, Cin, Ptot)   bf16   zero-padded flattened input (+halo cols)
    w_ref : (9, Cout, Cin)   bf16   per-tap weight matrices
    b_ref : (Cout, 1)        f32
    o_ref : (1, Cout, n_out) f32    output in padded flattened coordinates
    """
    cout = w_ref.shape[1]
    acc = jnp.zeros((cout, n_out), jnp.float32)
    for t, s in enumerate(shifts):                       # static Python loop
        xs = x_ref[0, :, s:s + n_out]                    # (Cin, N) static slice
        acc = acc + jnp.dot(w_ref[t], xs, preferred_element_type=jnp.float32)
    y = acc + b_ref[...]
    if act == 'lrelu':
        y = jnp.where(y >= 0, y, alpha * y)
    elif act == 'relu':
        y = jnp.maximum(y, 0.0)
    elif act == 'sigmoid':
        y = jax.nn.sigmoid(y)
    o_ref[0] = y.astype(o_ref.dtype)


def _mm_kernel(v_ref, w_ref, b_ref, o_ref, *, act, alpha):
    """Per-batch (Cout, K) @ (K, N) + bias + activation (lane-dense output)."""
    y = jnp.dot(w_ref[...], v_ref[0], preferred_element_type=jnp.float32)
    y = y + b_ref[...]
    if act == 'lrelu':
        y = jnp.where(y >= 0, y, alpha * y)
    elif act == 'relu':
        y = jnp.maximum(y, 0.0)
    elif act == 'sigmoid':
        y = jax.nn.sigmoid(y)
    o_ref[0] = y.astype(o_ref.dtype)


# ----------------------------------------------------------------------------
# Conv wrappers (thin JAX glue, all heavy math inside the Pallas kernels)
# ----------------------------------------------------------------------------
def conv3x3(x, w, b, stride=1, act='none', alpha=0.2):
    """3x3 conv, pad=1, NCHW.  x:(B,C,H,W) f32, w:(Cout,C,3,3), b:(Cout,)."""
    B, C, H, W = x.shape
    Cout = w.shape[0]
    Hp, Wp = H + 2, W + 2
    P = Hp * Wp                      # output computed in padded coords, cropped
    halo = W + 3                     # max |row-flattened tap shift|
    Ptot = P + 2 * halo

    # One padded+flattened copy of the activations; cast to bf16 fuses into it.
    xp = jnp.pad(x, ((0, 0), (0, 0), (1, 1), (1, 1)))
    xf = jnp.pad(xp.reshape(B, C, P), ((0, 0), (0, 0), (halo, halo)))
    xf = xf.astype(jnp.bfloat16)
    w9 = jnp.transpose(w, (2, 3, 0, 1)).reshape(9, Cout, C).astype(jnp.bfloat16)
    b2 = b.reshape(Cout, 1).astype(jnp.float32)
    shifts = tuple(halo + (ky - 1) * Wp + (kx - 1)
                   for ky in range(3) for kx in range(3))

    out = pl.pallas_call(
        functools.partial(_conv3x3_kernel, shifts=shifts, n_out=P,
                          act=act, alpha=alpha),
        out_shape=jax.ShapeDtypeStruct((B, Cout, P), jnp.float32),
        grid=(B,),
        in_specs=[
            pl.BlockSpec((1, C, Ptot), lambda i: (i, 0, 0)),
            pl.BlockSpec((9, Cout, C), lambda i: (0, 0, 0)),
            pl.BlockSpec((Cout, 1), lambda i: (0, 0)),
        ],
        out_specs=pl.BlockSpec((1, Cout, P), lambda i: (i, 0, 0)),
        compiler_params=pltpu.CompilerParams(
            dimension_semantics=("parallel",)),
    )(xf, w9, b2)

    out = out.reshape(B, Cout, Hp, Wp)[:, :, 1:H + 1, 1:W + 1]
    if stride == 2:
        out = out[:, :, ::2, ::2]
    return out


def matmul_chw(v, w2, b, act='none', alpha=0.1):
    """Per-batch lane-dense GEMM.  v:(B,K,N), w2:(Cout,K), b:(Cout,)."""
    B, K, N = v.shape
    Cout = w2.shape[0]
    if b is None:
        b = jnp.zeros((Cout,), jnp.float32)
    return pl.pallas_call(
        functools.partial(_mm_kernel, act=act, alpha=alpha),
        out_shape=jax.ShapeDtypeStruct((B, Cout, N), jnp.float32),
        grid=(B,),
        in_specs=[
            pl.BlockSpec((1, K, N), lambda i: (i, 0, 0)),
            pl.BlockSpec((Cout, K), lambda i: (0, 0)),
            pl.BlockSpec((Cout, 1), lambda i: (0, 0)),
        ],
        out_specs=pl.BlockSpec((1, Cout, N), lambda i: (i, 0, 0)),
        compiler_params=pltpu.CompilerParams(
            dimension_semantics=("parallel",)),
    )(v.astype(jnp.bfloat16), w2.astype(jnp.bfloat16),
      b.reshape(Cout, 1).astype(jnp.float32))


# ----------------------------------------------------------------------------
# Attention / DCN / misc building blocks
# ----------------------------------------------------------------------------
def lrelu(x, alpha):
    return jnp.where(x >= 0, x, alpha * x)


def se_layer(x, p):
    # Assumed SELayer: GAP -> FC(C, C//r) -> ReLU -> FC(C//r, C) -> Sigmoid.
    # Micro-GEMM: stays in plain jnp (Pallas launch overhead >> work).
    pooled = jnp.mean(x, axis=(2, 3))                        # (B, C)
    y = jax.nn.relu(pooled @ p['fc1_w'].T)
    y = jax.nn.sigmoid(y @ p['fc2_w'].T)
    return x * y[:, :, None, None]


def sa_layer(x, p):
    # TODO(synk): SALayer source not provided; assumed spatial attention
    # Conv1x1(C->C//r) -> ReLU -> Conv1x1(C//r->1) -> Sigmoid -> scale.
    w1, b1 = p['c1']['w'][:, :, 0, 0], p['c1']['b']
    w2, b2 = p['c2']['w'][:, :, 0, 0], p['c2']['b']
    y = jax.nn.relu(jnp.einsum('bchw,oc->bohw', x, w1) + b1[None, :, None, None])
    y = jax.nn.sigmoid(jnp.einsum('bchw,oc->bohw', y, w2) + b2[None, :, None, None])
    return x * y


def dcn_v2(x, offset, mask, w, b, dg, act='none', alpha=0.1):
    """Modulated deformable conv v2 (3x3, stride 1, pad 1, dilation 1).

    Bilinear gather stays group-granular plain-JAX glue (data-dependent
    addressing); the (Cout, C*9) @ (C*9, H*W) contraction + bias + act runs in
    the Pallas kernel with the spatial dim lane-dense.
    """
    # TODO(synk): fuse the bilinear gather into the Pallas kernel (feature maps
    # fit in VMEM); requires in-kernel dynamic gather, left as JAX glue for now.
    B, C, H, W = x.shape
    Cout = w.shape[0]
    cpg = C // dg

    # mmcv/torchvision layout: per group, per tap k: [dy_k, dx_k] interleaved.
    off = offset.reshape(B, dg, 9, 2, H, W)
    dy, dx = off[:, :, :, 0], off[:, :, :, 1]                # (B,dg,9,H,W)
    m = mask.reshape(B, dg, 9, H, W)

    k = jnp.arange(9)
    ky = (k // 3 - 1).astype(jnp.float32)
    kx = (k % 3 - 1).astype(jnp.float32)
    py = (jnp.arange(H, dtype=jnp.float32)[None, None, None, :, None]
          + ky[None, None, :, None, None] + dy)
    px = (jnp.arange(W, dtype=jnp.float32)[None, None, None, None, :]
          + kx[None, None, :, None, None] + dx)

    y0 = jnp.floor(py)
    x0 = jnp.floor(px)
    wy1 = py - y0
    wy0 = 1.0 - wy1
    wx1 = px - x0
    wx0 = 1.0 - wx1

    xg = x.reshape(B, dg, cpg, H * W)

    def gather(yi, xi):
        valid = (yi >= 0) & (yi <= H - 1) & (xi >= 0) & (xi <= W - 1)
        yc = jnp.clip(yi, 0, H - 1).astype(jnp.int32)
        xc = jnp.clip(xi, 0, W - 1).astype(jnp.int32)
        idx = (yc * W + xc).reshape(B, dg, 9 * H * W)        # (B,dg,9HW)
        g = jnp.take_along_axis(xg, idx[:, :, None, :], axis=3)
        g = g.reshape(B, dg, cpg, 9, H, W)
        return jnp.where(valid[:, :, None], g, 0.0)

    v00, v01 = gather(y0, x0), gather(y0, x0 + 1.0)
    v10, v11 = gather(y0 + 1.0, x0), gather(y0 + 1.0, x0 + 1.0)

    e = lambda t: t[:, :, None]                              # broadcast over cpg
    val = (v00 * e(wy0) * e(wx0) + v01 * e(wy0) * e(wx1)
           + v10 * e(wy1) * e(wx0) + v11 * e(wy1) * e(wx1)) * e(m)
    val = val.reshape(B, C * 9, H * W)                       # rows = ci*9 + k
    y = matmul_chw(val, w.reshape(Cout, C * 9), b, act=act, alpha=alpha)
    return y.reshape(B, Cout, H, W)


def dcn_pack_fwd(x, offset_feat, p, dg, act='none', alpha=0.1):
    """DCNv2Pack (basicsr): offsets + mask from a conv over `offset_feat`."""
    o = conv3x3(offset_feat, p['off']['w'], p['off']['b'])   # (B, dg*27, H, W)
    c = o.shape[1] // 3
    o1, o2, mk = o[:, :c], o[:, c:2 * c], o[:, 2 * c:]
    offset = jnp.concatenate([o1, o2], axis=1)               # (B, dg*18, H, W)
    mask = jax.nn.sigmoid(mk)
    return dcn_v2(x, offset, mask, p['w'], p['b'], dg, act=act, alpha=alpha)


def bilinear_up2(x):
    B, C, H, W = x.shape
    return jax.image.resize(x, (B, C, 2 * H, 2 * W), method='bilinear')


def nearest_up2(x):
    return jnp.repeat(jnp.repeat(x, 2, axis=2), 2, axis=3)


def wb(p):
    return p['w'], p['b']


# ----------------------------------------------------------------------------
# Network blocks
# ----------------------------------------------------------------------------
def residual_block_nobn(x, p):
    out = conv3x3(x, *wb(p['c1']), act='relu')
    out = conv3x3(out, *wb(p['c2']))
    return x + out


def rdb_fwd(x, p):
    x1 = conv3x3(x, *wb(p['conv1']), act='lrelu', alpha=0.2)
    x2 = conv3x3(jnp.concatenate([x, x1], 1), *wb(p['conv2']), act='lrelu', alpha=0.2)
    x3 = conv3x3(jnp.concatenate([x, x1, x2], 1), *wb(p['conv3']), act='lrelu', alpha=0.2)
    x4 = conv3x3(jnp.concatenate([x, x1, x2, x3], 1), *wb(p['conv4']), act='lrelu', alpha=0.2)
    x4 = se_layer(x4, p['conv4_att'])
    x4 = sa_layer(x4, p['conv4_sam'])
    x5 = conv3x3(jnp.concatenate([x, x1, x2, x3, x4], 1), *wb(p['conv5']))
    x5 = se_layer(x5, p['conv5_att'])
    x5 = sa_layer(x5, p['conv5_sam'])
    return x5 * 0.2 + x


def rrdb2_fwd(x, p):
    out = rdb_fwd(x, p['rdb1'])
    out = rdb_fwd(out, p['rdb2'])
    out = rdb_fwd(out, p['rdb3'])
    return out * 0.2 + x


def pcd_align_fwd(nbr_feat_l, p, dg):
    upsampled_offset, upsampled_feat = None, None
    feat = None
    for i in (3, 2, 1):
        lv = f'l{i}'
        offset = nbr_feat_l[i - 1]
        offset = conv3x3(offset, *wb(p[f'offset_conv1_{lv}']), act='lrelu', alpha=0.1)
        if i == 3:
            offset = conv3x3(offset, *wb(p[f'offset_conv2_{lv}']), act='lrelu', alpha=0.1)
        else:
            offset = conv3x3(jnp.concatenate([offset, upsampled_offset], 1),
                             *wb(p[f'offset_conv2_{lv}']), act='lrelu', alpha=0.1)
            offset = conv3x3(offset, *wb(p[f'offset_conv3_{lv}']), act='lrelu', alpha=0.1)
        if i == 3:
            feat = dcn_pack_fwd(nbr_feat_l[i - 1], offset, p[f'dcn_{lv}'], dg,
                                act='lrelu', alpha=0.1)
        else:
            feat = dcn_pack_fwd(nbr_feat_l[i - 1], offset, p[f'dcn_{lv}'], dg)
            feat_act = 'lrelu' if i > 1 else 'none'
            feat = conv3x3(jnp.concatenate([feat, upsampled_feat], 1),
                           *wb(p[f'feat_conv_{lv}']), act=feat_act, alpha=0.1)
        if i > 1:
            upsampled_offset = bilinear_up2(offset) * 2.0
            upsampled_feat = bilinear_up2(feat)
    # Cascading
    offset = conv3x3(feat, *wb(p['cas_offset_conv1']), act='lrelu', alpha=0.1)
    offset = conv3x3(offset, *wb(p['cas_offset_conv2']), act='lrelu', alpha=0.1)
    feat = dcn_pack_fwd(feat, offset, p['cas_dcn'], dg, act='lrelu', alpha=0.1)
    return feat


def rrdb_dcn_net_sesam(x, p, dg):
    feat = conv3x3(x, *wb(p['conv_first']))
    feat_l1 = feat
    for rb in p['feat_extract']:
        feat_l1 = residual_block_nobn(feat_l1, rb)
    feat_l2 = conv3x3(feat_l1, *wb(p['conv_l2_1']), stride=2, act='lrelu', alpha=0.2)
    feat_l2 = conv3x3(feat_l2, *wb(p['conv_l2_2']), act='lrelu', alpha=0.2)
    feat_l3 = conv3x3(feat_l2, *wb(p['conv_l3_1']), stride=2, act='lrelu', alpha=0.2)
    feat_l3 = conv3x3(feat_l3, *wb(p['conv_l3_2']), act='lrelu', alpha=0.2)

    aligned = pcd_align_fwd([feat_l1, feat_l2, feat_l3], p['pcd'], dg)

    body = aligned
    for rb in p['body']:
        body = rrdb2_fwd(body, rb)
    body = conv3x3(body, *wb(p['conv_body']['conv']))
    body = se_layer(body, p['conv_body']['se'])

    feat = feat + body
    feat = conv3x3(nearest_up2(feat), *wb(p['conv_up1']), act='lrelu', alpha=0.2)
    feat = conv3x3(nearest_up2(feat), *wb(p['conv_up2']), act='lrelu', alpha=0.2)
    feat = conv3x3(feat, *wb(p['conv_hr']), act='lrelu', alpha=0.2)
    out = conv3x3(feat, *wb(p['conv_last']))
    return out


# ----------------------------------------------------------------------------
# Deterministic synthetic parameter init
# ----------------------------------------------------------------------------
class KeyGen:
    def __init__(self, seed=0):
        self.key = jax.random.PRNGKey(seed)

    def __call__(self):
        self.key, sub = jax.random.split(self.key)
        return sub


def conv_p(kg, cin, cout, ksize=3, scale=0.05):
    return {'w': jax.random.normal(kg(), (cout, cin, ksize, ksize), jnp.float32) * scale,
            'b': jax.random.normal(kg(), (cout,), jnp.float32) * scale}


def se_p(kg, c, r=8, scale=0.1):
    return {'fc1_w': jax.random.normal(kg(), (c // r, c), jnp.float32) * scale,
            'fc2_w': jax.random.normal(kg(), (c, c // r), jnp.float32) * scale}


def sa_p(kg, c, r=8):
    return {'c1': conv_p(kg, c, max(c // r, 1), 1, 0.1),
            'c2': conv_p(kg, max(c // r, 1), 1, 1, 0.1)}


def dcn_p(kg, cin, cout, dg):
    return {'off': conv_p(kg, cin, dg * 3 * 9, 3, 0.01),
            'w': jax.random.normal(kg(), (cout, cin, 3, 3), jnp.float32) * 0.05,
            'b': jax.random.normal(kg(), (cout,), jnp.float32) * 0.05}


def rdb_p(kg, nf, gc):
    return {'conv1': conv_p(kg, nf, gc),
            'conv2': conv_p(kg, nf + gc, gc),
            'conv3': conv_p(kg, nf + 2 * gc, gc),
            'conv4': conv_p(kg, nf + 3 * gc, gc),
            'conv4_att': se_p(kg, gc), 'conv4_sam': sa_p(kg, gc),
            'conv5': conv_p(kg, nf + 4 * gc, nf),
            'conv5_att': se_p(kg, nf), 'conv5_sam': sa_p(kg, nf)}


def rrdb_p(kg, nf, gc):
    return {'rdb1': rdb_p(kg, nf, gc), 'rdb2': rdb_p(kg, nf, gc), 'rdb3': rdb_p(kg, nf, gc)}


def pcd_p(kg, nf, dg):
    p = {}
    for i in (3, 2, 1):
        lv = f'l{i}'
        p[f'offset_conv1_{lv}'] = conv_p(kg, nf, nf)
        if i == 3:
            p[f'offset_conv2_{lv}'] = conv_p(kg, nf, nf)
        else:
            p[f'offset_conv2_{lv}'] = conv_p(kg, 2 * nf, nf)
            p[f'offset_conv3_{lv}'] = conv_p(kg, nf, nf)
        p[f'dcn_{lv}'] = dcn_p(kg, nf, nf, dg)
        if i < 3:
            p[f'feat_conv_{lv}'] = conv_p(kg, 2 * nf, nf)
    p['cas_offset_conv1'] = conv_p(kg, nf, nf)
    p['cas_offset_conv2'] = conv_p(kg, nf, nf)
    p['cas_dcn'] = dcn_p(kg, nf, nf, dg)
    return p


def net_p(kg, cin, cout, nf, nb, gc, neb, dg):
    return {
        'conv_first': conv_p(kg, cin, nf),
        'feat_extract': [{'c1': conv_p(kg, nf, nf), 'c2': conv_p(kg, nf, nf)}
                         for _ in range(neb)],
        'body': [rrdb_p(kg, nf, gc) for _ in range(nb)],
        'conv_body': {'conv': conv_p(kg, nf, nf), 'se': se_p(kg, nf)},
        'conv_up1': conv_p(kg, nf, nf), 'conv_up2': conv_p(kg, nf, nf),
        'conv_hr': conv_p(kg, nf, nf), 'conv_last': conv_p(kg, nf, cout),
        'conv_l2_1': conv_p(kg, nf, nf), 'conv_l2_2': conv_p(kg, nf, nf),
        'conv_l3_1': conv_p(kg, nf, nf), 'conv_l3_2': conv_p(kg, nf, nf),
        'pcd': pcd_p(kg, nf, dg),
    }


# ----------------------------------------------------------------------------
if __name__ == "__main__":
    # Small config consistent with the module (num_feat divisible by
    # deformable_groups and by the SE reduction 8; H,W divisible by 4).
    NUM_IN_CH, NUM_OUT_CH = 3, 3
    NUM_FEAT, NUM_GROW_CH = 16, 16
    NUM_BLOCK, NUM_EXTRACT_BLOCK = 1, 1
    DEFORMABLE_GROUPS = 2
    B, H, W = 2, 16, 16

    kg = KeyGen(seed=0)
    params = net_p(kg, NUM_IN_CH, NUM_OUT_CH, NUM_FEAT, NUM_BLOCK,
                   NUM_GROW_CH, NUM_EXTRACT_BLOCK, DEFORMABLE_GROUPS)

    x = jax.random.normal(jax.random.PRNGKey(0), (B, NUM_IN_CH, H, W), jnp.float32)

    # Sanity check: Pallas 9-tap conv kernel vs XLA conv (bf16-input tolerance).
    xc = jax.random.normal(jax.random.PRNGKey(1), (B, NUM_FEAT, H, W), jnp.float32)
    wc, bc = params['conv_l2_2']['w'], params['conv_l2_2']['b']
    ref = jax.lax.conv_general_dilated(
        xc, wc, (1, 1), ((1, 1), (1, 1)),
        dimension_numbers=('NCHW', 'OIHW', 'NCHW')) + bc[None, :, None, None]
    got = jax.jit(lambda a, w, b: conv3x3(a, w, b))(xc, wc, bc)
    err = float(jnp.max(jnp.abs(got - ref)))
    assert err < 1e-1, f"conv3x3 kernel mismatch vs XLA conv: max abs err {err}"

    fwd = jax.jit(functools.partial(rrdb_dcn_net_sesam, dg=DEFORMABLE_GROUPS))
    out = jax.block_until_ready(fwd(x, params))

    assert out.shape == (B, NUM_OUT_CH, 4 * H, 4 * W), out.shape
    assert bool(jnp.all(jnp.isfinite(out)))
    print("KERNEL_OK")
</pallas_src>

<mosaic_0001>
module attributes {stable_mosaic.version = 11 : i64} {
  func.func @_conv3x3_kernel(%arg0: i32, %arg1: memref<1x16x362xbf16, #tpu.memory_space<vmem>>, %arg2: memref<9x16x16xbf16, #tpu.memory_space<vmem>>, %arg3: memref<16x1xf32, #tpu.memory_space<vmem>>, %arg4: memref<1x16x324xf32, #tpu.memory_space<vmem>>) attributes {dimension_semantics = [#tpu.dimension_semantics<parallel>], iteration_bounds = array<i64: 2>, scalar_prefetch = 0 : i64, scratch_operands = 0 : i64, tpu.core_type = #tpu.core_type<tc>, window_params = [{transform_indices = @transform_0, window_bounds = array<i64: 1, 16, 362>}, {pipeline_mode = #tpu.pipeline_mode<synchronous>, transform_indices = @transform_1, window_bounds = array<i64: 9, 16, 16>}, {pipeline_mode = #tpu.pipeline_mode<synchronous>, transform_indices = @transform_2, window_bounds = array<i64: 16, 1>}, {transform_indices = @transform_3, window_bounds = array<i64: 1, 16, 324>}]} {
    %cst = arith.constant 0.000000e+00 : f32
    %0 = vector.broadcast %cst : f32 to vector<16x324xf32>
    %c0 = arith.constant 0 : index
    %c0_0 = arith.constant 0 : index
    %c0_1 = arith.constant 0 : index
    %1 = vector.load %arg1[%c0, %c0_0, %c0_1] : memref<1x16x362xbf16, #tpu.memory_space<vmem>>, vector<1x16x324xbf16>
    %2 = vector.shape_cast %1 : vector<1x16x324xbf16> to vector<16x324xbf16>
    %c0_2 = arith.constant 0 : index
    %c0_3 = arith.constant 0 : index
    %c0_4 = arith.constant 0 : index
    %3 = vector.load %arg2[%c0_2, %c0_3, %c0_4] : memref<9x16x16xbf16, #tpu.memory_space<vmem>>, vector<1x16x16xbf16>
    %4 = vector.shape_cast %3 : vector<1x16x16xbf16> to vector<16x16xbf16>
    %cst_5 = arith.constant dense<0.000000e+00> : vector<16x324xf32>
    %5 = tpu.matmul %4, %2, %cst_5 {dimension_numbers = #tpu.dot_dimension_numbers<[1], [0], [0], [1], [0, 0, 1, 1], [], []>} : vector<16x16xbf16>, vector<16x324xbf16>, vector<16x324xf32> -> vector<16x324xf32>
    %6 = arith.addf %0, %5 : vector<16x324xf32>
    %c0_6 = arith.constant 0 : index
    %c0_7 = arith.constant 0 : index
    %c1 = arith.constant 1 : index
    %7 = vector.load %arg1[%c0_6, %c0_7, %c1] : memref<1x16x362xbf16, #tpu.memory_space<vmem>>, vector<1x16x324xbf16>
    %8 = vector.shape_cast %7 : vector<1x16x324xbf16> to vector<16x324xbf16>
    %c1_8 = arith.constant 1 : index
    %c0_9 = arith.constant 0 : index
    %c0_10 = arith.constant 0 : index
    %9 = vector.load %arg2[%c1_8, %c0_9, %c0_10] : memref<9x16x16xbf16, #tpu.memory_space<vmem>>, vector<1x16x16xbf16>
    %10 = vector.shape_cast %9 : vector<1x16x16xbf16> to vector<16x16xbf16>
    %cst_11 = arith.constant dense<0.000000e+00> : vector<16x324xf32>
    %11 = tpu.matmul %10, %8, %cst_11 {dimension_numbers = #tpu.dot_dimension_numbers<[1], [0], [0], [1], [0, 0, 1, 1], [], []>} : vector<16x16xbf16>, vector<16x324xbf16>, vector<16x324xf32> -> vector<16x324xf32>
    %12 = arith.addf %6, %11 : vector<16x324xf32>
    %c0_12 = arith.constant 0 : index
    %c0_13 = arith.constant 0 : index
    %c2 = arith.constant 2 : index
    %13 = vector.load %arg1[%c0_12, %c0_13, %c2] : memref<1x16x362xbf16, #tpu.memory_space<vmem>>, vector<1x16x324xbf16>
    %14 = vector.shape_cast %13 : vector<1x16x324xbf16> to vector<16x324xbf16>
    %c2_14 = arith.constant 2 : index
    %c0_15 = arith.constant 0 : index
    %c0_16 = arith.constant 0 : index
    %15 = vector.load %arg2[%c2_14, %c0_15, %c0_16] : memref<9x16x16xbf16, #tpu.memory_space<vmem>>, vector<1x16x16xbf16>
    %16 = vector.shape_cast %15 : vector<1x16x16xbf16> to vector<16x16xbf16>
    %cst_17 = arith.constant dense<0.000000e+00> : vector<16x324xf32>
    %17 = tpu.matmul %16, %14, %cst_17 {dimension_numbers = #tpu.dot_dimension_numbers<[1], [0], [0], [1], [0, 0, 1, 1], [], []>} : vector<16x16xbf16>, vector<16x324xbf16>, vector<16x324xf32> -> vector<16x324xf32>
    %18 = arith.addf %12, %17 : vector<16x324xf32>
    %c0_18 = arith.constant 0 : index
    %c0_19 = arith.constant 0 : index
    %c18 = arith.constant 18 : index
    %19 = vector.load %arg1[%c0_18, %c0_19, %c18] : memref<1x16x362xbf16, #tpu.memory_space<vmem>>, vector<1x16x324xbf16>
    %20 = vector.shape_cast %19 : vector<1x16x324xbf16> to vector<16x324xbf16>
    %c3 = arith.constant 3 : index
    %c0_20 = arith.constant 0 : index
    %c0_21 = arith.constant 0 : index
    %21 = vector.load %arg2[%c3, %c0_20, %c0_21] : memref<9x16x16xbf16, #tpu.memory_space<vmem>>, vector<1x16x16xbf16>
    %22 = vector.shape_cast %21 : vector<1x16x16xbf16> to vector<16x16xbf16>
    %cst_22 = arith.constant dense<0.000000e+00> : vector<16x324xf32>
    %23 = tpu.matmul %22, %20, %cst_22 {dimension_numbers = #tpu.dot_dimension_numbers<[1], [0], [0], [1], [0, 0, 1, 1], [], []>} : vector<16x16xbf16>, vector<16x324xbf16>, vector<16x324xf32> -> vector<16x324xf32>
    %24 = arith.addf %18, %23 : vector<16x324xf32>
    %c0_23 = arith.constant 0 : index
    %c0_24 = arith.constant 0 : index
    %c19 = arith.constant 19 : index
    %25 = vector.load %arg1[%c0_23, %c0_24, %c19] : memref<1x16x362xbf16, #tpu.memory_space<vmem>>, vector<1x16x324xbf16>
    %26 = vector.shape_cast %25 : vector<1x16x324xbf16> to vector<16x324xbf16>
    %c4 = arith.constant 4 : index
    %c0_25 = arith.constant 0 : index
    %c0_26 = arith.constant 0 : index
    %27 = vector.load %arg2[%c4, %c0_25, %c0_26] : memref<9x16x16xbf16, #tpu.memory_space<vmem>>, vector<1x16x16xbf16>
    %28 = vector.shape_cast %27 : vector<1x16x16xbf16> to vector<16x16xbf16>
    %cst_27 = arith.constant dense<0.000000e+00> : vector<16x324xf32>
    %29 = tpu.matmul %28, %26, %cst_27 {dimension_numbers = #tpu.dot_dimension_numbers<[1], [0], [0], [1], [0, 0, 1, 1], [], []>} : vector<16x16xbf16>, vector<16x324xbf16>, vector<16x324xf32> -> vector<16x324xf32>
    %30 = arith.addf %24, %29 : vector<16x324xf32>
    %c0_28 = arith.constant 0 : index
    %c0_29 = arith.constant 0 : index
    %c20 = arith.constant 20 : index
    %31 = vector.load %arg1[%c0_28, %c0_29, %c20] : memref<1x16x362xbf16, #tpu.memory_space<vmem>>, vector<1x16x324xbf16>
    %32 = vector.shape_cast %31 : vector<1x16x324xbf16> to vector<16x324xbf16>
    %c5 = arith.constant 5 : index
    %c0_30 = arith.constant 0 : index
    %c0_31 = arith.constant 0 : index
    %33 = vector.load %arg2[%c5, %c0_30, %c0_31] : memref<9x16x16xbf16, #tpu.memory_space<vmem>>, vector<1x16x16xbf16>
    %34 = vector.shape_cast %33 : vector<1x16x16xbf16> to vector<16x16xbf16>
    %cst_32 = arith.constant dense<0.000000e+00> : vector<16x324xf32>
    %35 = tpu.matmul %34, %32, %cst_32 {dimension_numbers = #tpu.dot_dimension_numbers<[1], [0], [0], [1], [0, 0, 1, 1], [], []>} : vector<16x16xbf16>, vector<16x324xbf16>, vector<16x324xf32> -> vector<16x324xf32>
    %36 = arith.addf %30, %35 : vector<16x324xf32>
    %c0_33 = arith.constant 0 : index
    %c0_34 = arith.constant 0 : index
    %c36 = arith.constant 36 : index
    %37 = vector.load %arg1[%c0_33, %c0_34, %c36] : memref<1x16x362xbf16, #tpu.memory_space<vmem>>, vector<1x16x324xbf16>
    %38 = vector.shape_cast %37 : vector<1x16x324xbf16> to vector<16x324xbf16>
    %c6 = arith.constant 6 : index
    %c0_35 = arith.constant 0 : index
    %c0_36 = arith.constant 0 : index
    %39 = vector.load %arg2[%c6, %c0_35, %c0_36] : memref<9x16x16xbf16, #tpu.memory_space<vmem>>, vector<1x16x16xbf16>
    %40 = vector.shape_cast %39 : vector<1x16x16xbf16> to vector<16x16xbf16>
    %cst_37 = arith.constant dense<0.000000e+00> : vector<16x324xf32>
    %41 = tpu.matmul %40, %38, %cst_37 {dimension_numbers = #tpu.dot_dimension_numbers<[1], [0], [0], [1], [0, 0, 1, 1], [], []>} : vector<16x16xbf16>, vector<16x324xbf16>, vector<16x324xf32> -> vector<16x324xf32>
    %42 = arith.addf %36, %41 : vector<16x324xf32>
    %c0_38 = arith.constant 0 : index
    %c0_39 = arith.constant 0 : index
    %c37 = arith.constant 37 : index
    %43 = vector.load %arg1[%c0_38, %c0_39, %c37] : memref<1x16x362xbf16, #tpu.memory_space<vmem>>, vector<1x16x324xbf16>
    %44 = vector.shape_cast %43 : vector<1x16x324xbf16> to vector<16x324xbf16>
    %c7 = arith.constant 7 : index
    %c0_40 = arith.constant 0 : index
    %c0_41 = arith.constant 0 : index
    %45 = vector.load %arg2[%c7, %c0_40, %c0_41] : memref<9x16x16xbf16, #tpu.memory_space<vmem>>, vector<1x16x16xbf16>
    %46 = vector.shape_cast %45 : vector<1x16x16xbf16> to vector<16x16xbf16>
    %cst_42 = arith.constant dense<0.000000e+00> : vector<16x324xf32>
    %47 = tpu.matmul %46, %44, %cst_42 {dimension_numbers = #tpu.dot_dimension_numbers<[1], [0], [0], [1], [0, 0, 1, 1], [], []>} : vector<16x16xbf16>, vector<16x324xbf16>, vector<16x324xf32> -> vector<16x324xf32>
    %48 = arith.addf %42, %47 : vector<16x324xf32>
    %c0_43 = arith.constant 0 : index
    %c0_44 = arith.constant 0 : index
    %c38 = arith.constant 38 : index
    %49 = vector.load %arg1[%c0_43, %c0_44, %c38] : memref<1x16x362xbf16, #tpu.memory_space<vmem>>, vector<1x16x324xbf16>
    %50 = vector.shape_cast %49 : vector<1x16x324xbf16> to vector<16x324xbf16>
    %c8 = arith.constant 8 : index
    %c0_45 = arith.constant 0 : index
    %c0_46 = arith.constant 0 : index
    %51 = vector.load %arg2[%c8, %c0_45, %c0_46] : memref<9x16x16xbf16, #tpu.memory_space<vmem>>, vector<1x16x16xbf16>
    %52 = vector.shape_cast %51 : vector<1x16x16xbf16> to vector<16x16xbf16>
    %cst_47 = arith.constant dense<0.000000e+00> : vector<16x324xf32>
    %53 = tpu.matmul %52, %50, %cst_47 {dimension_numbers = #tpu.dot_dimension_numbers<[1], [0], [0], [1], [0, 0, 1, 1], [], []>} : vector<16x16xbf16>, vector<16x324xbf16>, vector<16x324xf32> -> vector<16x324xf32>
    %54 = arith.addf %48, %53 : vector<16x324xf32>
    %c0_48 = arith.constant 0 : index
    %c0_49 = arith.constant 0 : index
    %55 = vector.load %arg3[%c0_48, %c0_49] : memref<16x1xf32, #tpu.memory_space<vmem>>, vector<16x1xf32>
    %56 = vector.broadcast %55 : vector<16x1xf32> to vector<16x324xf32>
    %57 = arith.addf %54, %56 : vector<16x324xf32>
    %c0_50 = arith.constant 0 : index
    %c0_51 = arith.constant 0 : index
    %c0_52 = arith.constant 0 : index
    %58 = vector.load %arg4[%c0_50, %c0_51, %c0_52] : memref<1x16x324xf32, #tpu.memory_space<vmem>>, vector<1x16x324xf32>
    %59 = vector.shape_cast %58 : vector<1x16x324xf32> to vector<16x324xf32>
    %60 = vector.shape_cast %57 : vector<16x324xf32> to vector<1x16x324xf32>
    tpu.vector_store %arg4[%c0_50, %c0_51, %c0_52], %60 {strides = array<i32>} : memref<1x16x324xf32, #tpu.memory_space<vmem>>, vector<1x16x324xf32>,
    return
  }
  func.func @transform_0(%arg0: i32) -> (i32, i32, i32) {
    %c0_i32 = arith.constant 0 : i32
    %c0_i32_0 = arith.constant 0 : i32
    %c0_i32_1 = arith.constant 0 : i32
    return %arg0, %c0_i32, %c0_i32_0 : i32, i32, i32
  }
  func.func @transform_1(%arg0: i32) -> (i32, i32, i32) {
    %c0_i32 = arith.constant 0 : i32
    %c0_i32_0 = arith.constant 0 : i32
    %c0_i32_1 = arith.constant 0 : i32
    %c0_i32_2 = arith.constant 0 : i32
    return %c0_i32, %c0_i32_0, %c0_i32_1 : i32, i32, i32
  }
  func.func @transform_2(%arg0: i32) -> (i32, i32) {
    %c0_i32 = arith.constant 0 : i32
    %c0_i32_0 = arith.constant 0 : i32
    %c0_i32_1 = arith.constant 0 : i32
    return %c0_i32, %c0_i32_0 : i32, i32
  }
  func.func @transform_3(%arg0: i32) -> (i32, i32, i32) {
    %c0_i32 = arith.constant 0 : i32
    %c0_i32_0 = arith.constant 0 : i32
    %c0_i32_1 = arith.constant 0 : i32
    return %arg0, %c0_i32, %c0_i32_0 : i32, i32, i32
  }
}

</mosaic_0001>

<bundles_post_ra>
// kernel: _lambda_.1
= control target key start
LH: loop header
LB: loop body
LE: loop exit
PB: predicated region body
PF: predicated region fallthrough
CT: control target
= control target key end

     0   :  { %s1057_s12 = smov 0   ;;  %s1166_s0 = inlined_call_operand.vmem [shape: bf16[2,16,362], index: 0, kind: input, shape index: {}]   ;;  %s1167_s1 = inlined_call_operand.vmem [shape: bf16[9,16,16], index: 1, kind: input, shape index: {}]   ;;  %s1168_s2 = inlined_call_operand.vmem [shape: f32[16,1], index: 2, kind: input, shape index: {}]   ;;  %s1169_s3 = inlined_call_operand.vmem [shape: f32[2,16,324], index: 3, kind: output, shape index: {}]  }
   0x1 LB: > { %s887_s13 = sadd.s32 4294967295, %s1026_s12   ;;  %p891_p0 = scmp.ge.s32.totalorder %s1026_s12, 1  ;;  %s1026_s12 = sphi %s1057_s12, %s13_s12  }
   0x2   : > { %p137_p1 = scmp.lt.s32.totalorder %s1026_s12, 3 }
   0x4   : > { %p138_p2 = pnand %p891_p0, %p137_p1 }
   0x5   : > { %p161_p3 = scmp.lt.s32.totalorder (!%p138_p2), %s887_s13, 1  ;;  %s1028_s18 = smov (!%p138_p2), 127  }
   0x6   : > { %141 = sbr.rel (%p138_p2) target bundleno = 380 (0x17c), region = 32  ;;  %s1029_s19 = smov (!%p138_p2), 126  }
   0x7   : > { %s1030_s20 = smov (!%p138_p2), 110   ;;  %s1031_s21 = smov (!%p138_p2), 109  }
   0x8   : > { %s1032_s22 = smov (!%p138_p2), 108   ;;  %s1033_s23 = smov (!%p138_p2), 92  }
   0x9   : > { %s1034_s24 = smov (!%p138_p2), 91   ;;  %s1035_s25 = smov (!%p138_p2), 90  }
   0xb   : > { %s1171_s13 = smov (!%p161_p3, %s887_s13), 1  ;;  %v990_v9 = vld [vmem:[%s1167_s1] sm:$0xff]  ;;  %vm211_vm0 = vcmask 130048   ;;  %vm324_vm1 = vcmask 1031168   ;;  %v1079_v13 = vld [vmem:[%s1167_s1 + $0x10] sm:$0xff]  ;;  %vm205_vm2 = vcmask 1039360  }
   0xc   : > { %s999_s14 = smul.u32 24, %s1171_s13  ;;  %v991_v15 = vld [vmem:[%s1167_s1 + $0x8] sm:$0xff]  ;;  %vm395_vm3 = vcmask 900096   ;;  %v993_v27 = vld [vmem:[%s1167_s1 + $0x18] sm:$0xff]  ;;  %vm466_vm4 = vcmask 891904   ;;  %vm537_vm5 = vcmask 883712  }
   0xd   : > { %v995_v37 = vld [vmem:[%s1167_s1 + $0x28] sm:$0xff]  ;;  %vm608_vm6 = vcmask 752640   ;;  %vm679_vm7 = vcmask 744448   ;;  %v994_v44 = vld [vmem:[%s1167_s1 + $0x20] sm:$0xff]  ;;  %v996_v49 = vld [vmem:[%s1167_s1 + $0x30] sm:$0xff]  ;;  %vm750_vm8 = vcmask 736256  }
   0xe   : > { %s165_s17 = scalar_lea.vmem %s1166_s0, %s999_s14  ;;  %v997_v53 = vld [vmem:[%s1167_s1 + $0x38] sm:$0xff]  ;;  %v807_v57 = vld [vmem:[%s1168_s2] sm:$0xff]  ;;  %v808_v58 = vld [vmem:[%s1168_s2 + $0x8] sm:$0xff]  ;;  %v1036_v59 = vmov 0   ;;  %vm827_vm9 = vcmask 556032  }
   0xf   : > { %v910_v0 = vld [vmem:[%s165_s17 + $0x8] sm:$0xf]  ;;  %v989_v1 = vld [vmem:[%s165_s17 + $0x10] sm:$0xf0]  ;;  %v987_v2 = vld [vmem:[%s165_s17 + $0x4] sm:$0xf]  ;;  %1018 = vset.pattern.permute.xlu0 %v1036_v59  ;;  %1019 = vset.pattern.permute.xlu1 %v1036_v59 }
  0x10   : > { %v911_v3 = vor.u32 %v989_v1, %v910_v0  ;;  %v904_v4 = vld [vmem:[%s165_s17 + $0xc] sm:$0xf0]  ;;  %v902_v5 = vld [vmem:[%s165_s17] sm:$0xf]  ;;  %v988_v6 = vld [vmem:[%s165_s17 + $0x8] sm:$0xf0] }
  0x11   : > { %v907_v7 = vor.u32 %v987_v2, %v904_v4  ;;  %v903_v8 = vor.u32 %v988_v6, %v902_v5  ;;  %v998_v60 = vld [vmem:[%s1167_s1 + $0x40] sm:$0xff] }
  0x12   : > { %203 = vrot.lane.b32.xlu0 %v911_v3, %s1028_s18 }
  0x13   : > { %201 = vrot.lane.b32.xlu1 %v907_v7, %s1028_s18  ;;  %320 = vrot.lane.b32.xlu2 %v907_v7, %s1029_s19 }
  0x14   : > { %275 = vmatpush.bf16.msra.mxu3 %v903_v8 }
  0x17   : > { %919 = vmatmul.msk.bf16.vlgmr.msra.gmra.mxu3 %vm211_vm0, %v990_v9 }
  0x1a   : > { %199 = vrot.lane.b32.xlu0 %v903_v8, %s1028_s18 }
  0x1b   : > { %318 = vrot.lane.b32.xlu1 %v903_v8, %s1029_s19  ;;  %322 = vrot.lane.b32.xlu2 %v911_v3, %s1029_s19 }
  0x22   : > { %391 = vrot.lane.b32.xlu0 %v907_v7, %s1030_s20 }
  0x23   : > { %393 = vrot.lane.b32.xlu1 %v911_v3, %s1030_s20  ;;  %389 = vrot.lane.b32.xlu2 %v903_v8, %s1030_s20 }
  0x2a   : > { %464 = vrot.lane.b32.xlu0 %v911_v3, %s1031_s21 }
  0x2b   : > { %460 = vrot.lane.b32.xlu1 %v903_v8, %s1031_s21  ;;  %462 = vrot.lane.b32.xlu2 %v907_v7, %s1031_s21 }
  0x32   : > { %531 = vrot.lane.b32.xlu0 %v903_v8, %s1032_s22 }
  0x33   : > { %533 = vrot.lane.b32.xlu1 %v907_v7, %s1032_s22  ;;  %602 = vrot.lane.b32.xlu2 %v903_v8, %s1033_s23 }
  0x3a   : > { %604 = vrot.lane.b32.xlu0 %v907_v7, %s1033_s23 }
  0x3b   : > { %535 = vrot.lane.b32.xlu1 %v911_v3, %s1032_s22  ;;  %606 = vrot.lane.b32.xlu2 %v911_v3, %s1033_s23  ;;  %s1000_s23 = smul.u32 48, %s1171_s13 }
  0x3d   : > { %s1150_s26 = scalar_lea.vmem %s1169_s3, %s1000_s23 }
  0x42   : > { %675 = vrot.lane.b32.xlu0 %v907_v7, %s1034_s24 }
  0x43   : > { %677 = vrot.lane.b32.xlu1 %v911_v3, %s1034_s24  ;;  %673 = vrot.lane.b32.xlu2 %v903_v8, %s1034_s24 }
  0x4a   : > { %748 = vrot.lane.b32.xlu0 %v911_v3, %s1035_s25 }
  0x4b   : > { %744 = vrot.lane.b32.xlu1 %v903_v8, %s1035_s25  ;;  %746 = vrot.lane.b32.xlu2 %v907_v7, %s1035_s25 }
  0x52   : > { %811 = vperm.xlu0 %1018, %v807_v57  }
  0x53   : > { %816 = vperm.xlu1 %1019, %v808_v58  }
  0x6d   : > { %v321_v10 = vpop.permute.xlu2 %320 }
  0x75   : > { %v323_v11 = vpop.permute.xlu2 %322 }
  0x76   : > { %v326_v12 = vsel %vm324_vm1, %v321_v10, %v323_v11 }
  0x77   : > { %354 = vmatpush.bf16.msrb.mxu3 %v326_v12 }
  0x7a   : > { %929 = vmatmul.msk.bf16.vlgmr.msrb.gmra.mxu3 %vm211_vm0, %v1079_v13 }
  0x7d   : > { %v390_v22 = vpop.permute.xlu2 %389 }
  0x84   : > { %v204_v14 = vpop.permute.xlu0 %203 }
  0x85   : > { %v202_v16 = vpop.permute.xlu1 %201  ;;  %250 = vmatpush.bf16.msra.mxu2 %v204_v14  ;;  %v463_v28 = vpop.permute.xlu2 %462 }
  0x86   : > { %v207_v17 = vsel %vm205_vm2, %v202_v16, %v204_v14 }
  0x87   : > { %236 = vmatpush.bf16.msra.mxu1 %v207_v17 }
  0x88   : > { %914 = vmatmul.msk.bf16.vlgmr.msra.gmra.mxu2 %vm211_vm0, %v991_v15 }
  0x8a   : > { %913 = vmatmul.msk.bf16.vlgmr.msra.gmra.mxu1 %vm211_vm0, %v991_v15 }
  0x8b   : > { %303 = vmatpush.bf16.msrb.mxu1 %v911_v3 }
  0x8c   : > { %v200_v18 = vpop.permute.xlu0 %199 }
  0x8d   : > { %v319_v19 = vpop.permute.xlu1 %318  ;;  %v206_v20 = vsel %vm205_vm2, %v200_v18, %v202_v16  ;;  %v603_v33 = vpop.permute.xlu2 %602 }
  0x8e   : > { %222 = vmatpush.bf16.msra.mxu0 %v206_v20  ;;  %v325_v21 = vsel %vm324_vm1, %v319_v19, %v321_v10 }
  0x8f   : > { %340 = vmatpush.bf16.msrb.mxu2 %v325_v21 }
  0x91   : > { %912 = vmatmul.msk.bf16.vlgmr.msra.gmra.mxu0 %vm211_vm0, %v991_v15 }
  0x92   : > { %289 = vmatpush.bf16.msrb.mxu0 %v907_v7 }
  0x94   : > { %v392_v23 = vpop.permute.xlu0 %391 }
  0x95   : > { %v396_v24 = vsel %vm395_vm3, %v390_v22, %v392_v23  ;;  %v394_v25 = vpop.permute.xlu1 %393  ;;  %v607_v38 = vpop.permute.xlu2 %606 }
  0x96   : > { %368 = vmatpush.bf16.msra.mxu0 %v323_v11  ;;  %v397_v26 = vsel %vm395_vm3, %v392_v23, %v394_v25  ;;  %439 = vmatpush.bf16.msra.mxu3 %v394_v25 }
  0x97   : > { %411 = vmatpush.bf16.msra.mxu1 %v396_v24  ;;  %425 = vmatpush.bf16.msra.mxu2 %v397_v26 }
  0x98   : > { %928 = vmatmul.msk.bf16.vlgmr.msrb.gmra.mxu2 %vm211_vm0, %v1079_v13 }
  0x99   : > { %939 = vmatmul.msk.bf16.vlgmr.msra.gmra.mxu3 %vm211_vm0, %v993_v27 }
  0x9a   : > { %921 = vmatmul.msk.bf16.vlgmr.msrb.gmra.mxu1 %vm211_vm0, %v990_v9  ;;  %v277_v61 = vpop.f32.mrf.mxu3 }
  0x9c   : > { %v465_v29 = vpop.permute.xlu0 %464 }
  0x9d   : > { %v461_v30 = vpop.permute.xlu1 %460  ;;  %v468_v31 = vsel %vm466_vm4, %v463_v28, %v465_v29  ;;  %510 = vmatpush.bf16.msrb.mxu2 %v465_v29  ;;  %v674_v46 = vpop.permute.xlu2 %673 }
  0x9e   : > { %496 = vmatpush.bf16.msrb.mxu1 %v468_v31  ;;  %v467_v32 = vsel %vm466_vm4, %v461_v30, %v463_v28 }
  0xa1   : > { %920 = vmatmul.msk.bf16.vlgmr.msrb.gmra.mxu0 %vm211_vm0, %v990_v9 }
  0xa2   : > { %482 = vmatpush.bf16.msrb.mxu0 %v467_v32  ;;  %v279_v0 = vpop.f32.mrf.mxu3 }
  0xa4   : > { %v532_v34 = vpop.permute.xlu0 %531 }
  0xa5   : > { %v534_v35 = vpop.permute.xlu1 %533  ;;  %v747_v52 = vpop.permute.xlu2 %746 }
  0xa6   : > { %v538_v36 = vsel %vm537_vm5, %v532_v34, %v534_v35 }
  0xa7   : > { %553 = vmatpush.bf16.msrb.mxu3 %v538_v36 }
  0xa8   : > { %938 = vmatmul.msk.bf16.vlgmr.msra.gmra.mxu2 %vm211_vm0, %v993_v27 }
  0xaa   : > { %937 = vmatmul.msk.bf16.vlgmr.msra.gmra.mxu1 %vm211_vm0, %v993_v27  ;;  %955 = vmatmul.msk.bf16.vlgmr.msrb.gmra.mxu3 %vm211_vm0, %v995_v37 }
  0xac   : > { %v605_v39 = vpop.permute.xlu0 %604 }
  0xad   : > { %v536_v40 = vpop.permute.xlu1 %535  ;;  %v609_v41 = vsel %vm608_vm6, %v603_v33, %v605_v39  ;;  %v610_v42 = vsel %vm608_vm6, %v605_v39, %v607_v38 }
  0xae   : > { %624 = vmatpush.bf16.msra.mxu2 %v609_v41  ;;  %638 = vmatpush.bf16.msra.mxu3 %v610_v42  ;;  %v539_v43 = vsel %vm537_vm5, %v534_v35, %v536_v40 }
  0xaf   : > { %581 = vmatpush.bf16.msra.mxu1 %v536_v40 }
  0xb1   : > { %930 = vmatmul.msk.bf16.vlgmr.msra.gmra.mxu0 %vm211_vm0, %v1079_v13 }
  0xb2   : > { %567 = vmatpush.bf16.msra.mxu0 %v539_v43 }
  0xb4   : > { %v676_v45 = vpop.permute.xlu0 %675 }
  0xb5   : > { %v678_v47 = vpop.permute.xlu1 %677  ;;  %v680_v50 = vsel %vm679_vm7, %v674_v46, %v676_v45 }
  0xb6   : > { %v681_v48 = vsel %vm679_vm7, %v676_v45, %v678_v47  ;;  %723 = vmatpush.bf16.msrb.mxu3 %v678_v47 }
  0xb8   : > { %948 = vmatmul.msk.bf16.vlgmr.msrb.gmra.mxu2 %vm211_vm0, %v994_v44 }
  0xb9   : > { %709 = vmatpush.bf16.msrb.mxu2 %v681_v48 }
  0xba   : > { %947 = vmatmul.msk.bf16.vlgmr.msrb.gmra.mxu1 %vm211_vm0, %v994_v44  ;;  %965 = vmatmul.msk.bf16.vlgmr.msra.gmra.mxu3 %vm211_vm0, %v996_v49 }
  0xbb   : > { %695 = vmatpush.bf16.msrb.mxu1 %v680_v50 }
  0xbc   : > { %v749_v51 = vpop.permute.xlu0 %748 }
  0xbd   : > { %v752_v54 = vsel %vm750_vm8, %v747_v52, %v749_v51  ;;  %v745_v55 = vpop.permute.xlu1 %744 }
  0xbe   : > { %v751_v56 = vsel %vm750_vm8, %v745_v55, %v747_v52 }
  0xc1   : > { %946 = vmatmul.msk.bf16.vlgmr.msrb.gmra.mxu0 %vm211_vm0, %v994_v44 }
  0xc2   : > { %652 = vmatpush.bf16.msrb.mxu0 %v607_v38 }
  0xc8   : > { %964 = vmatmul.msk.bf16.vlgmr.msra.gmra.mxu2 %vm211_vm0, %v996_v49 }
  0xc9   : > { %794 = vmatpush.bf16.msra.mxu2 %v749_v51 }
  0xca   : > { %957 = vmatmul.msk.bf16.vlgmr.msra.gmra.mxu1 %vm211_vm0, %v995_v37  ;;  %975 = vmatmul.msk.bf16.vlgmr.msrb.gmra.mxu3 %vm211_vm0, %v997_v53 }
  0xcb   : > { %780 = vmatpush.bf16.msra.mxu1 %v752_v54 }
  0xd1   : > { %956 = vmatmul.msk.bf16.vlgmr.msra.gmra.mxu0 %vm211_vm0, %v995_v37 }
  0xd2   : > { %766 = vmatpush.bf16.msra.mxu0 %v751_v56 }
  0xd8   : > { %974 = vmatmul.msk.bf16.vlgmr.msrb.gmra.mxu2 %vm211_vm0, %v997_v53 }
  0xda   : > { %973 = vmatmul.msk.bf16.vlgmr.msrb.gmra.mxu1 %vm211_vm0, %v997_v53 }
  0xe1   : > { %966 = vmatmul.msk.bf16.vlgmr.msrb.gmra.mxu0 %vm211_vm0, %v996_v49 }
  0xe8   : > { %984 = vmatmul.msk.bf16.vlgmr.msra.gmra.mxu2 %vm211_vm0, %v998_v60 }
  0xea   : > { %983 = vmatmul.msk.bf16.vlgmr.msra.gmra.mxu1 %vm211_vm0, %v998_v60 }
  0xf1   : > { %982 = vmatmul.msk.bf16.vlgmr.msra.gmra.mxu0 %vm211_vm0, %v998_v60 }
  0xfd   : > { %v356_v5 = vpop.f32.mrf.mxu3 }
 0x105   : > { %v358_v14 = vpop.f32.mrf.mxu3 }
 0x107   : > { %v238_v62 = vpop.f32.mrf.mxu1 }
 0x10b   : > { %v252_v63 = vpop.f32.mrf.mxu2 }
 0x10e   : > { %v224_v1 = vpop.f32.mrf.mxu0 }
 0x10f   : > { %v240_v2 = vpop.f32.mrf.mxu1  ;;  %v278_v3 = vadd.f32 %v277_v61, %v224_v1 }
 0x113   : > { %v254_v4 = vpop.f32.mrf.mxu2 }
 0x116   : > { %v226_v6 = vpop.f32.mrf.mxu0 }
 0x117   : > { %v280_v7 = vadd.f32 %v279_v0, %v226_v6  ;;  %v305_v8 = vpop.f32.mrf.mxu1  ;;  %v812_v6 = vpop.permute.xlu0 %811 }
 0x118   : > { %v306_v9 = vadd.f32 %v305_v8, %v252_v63 }
 0x11b   : > { %v342_v10 = vpop.f32.mrf.mxu2 }
 0x11c   : > { %v375_v11 = vadd.f32 %v342_v10, %v278_v3  ;;  %v441_v20 = vpop.f32.mrf.mxu3 }
 0x11e   : > { %v291_v12 = vpop.f32.mrf.mxu0 }
 0x11f   : > { %v307_v13 = vpop.f32.mrf.mxu1  ;;  %v292_v41 = vadd.f32 %v291_v12, %v238_v62 }
 0x120   : > { %v308_v15 = vadd.f32 %v307_v13, %v254_v4 }
 0x121   : > { %v376_v44 = vadd.f32 %v356_v5, %v292_v41 }
 0x123   : > { %v344_v16 = vpop.f32.mrf.mxu2 }
 0x124   : > { %v1140_v17 = vadd.f32 %v344_v16, %v280_v7  ;;  %v443_v25 = vpop.f32.mrf.mxu3 }
 0x126   : > { %v293_v18 = vpop.f32.mrf.mxu0 }
 0x127   : > { %v413_v19 = vpop.f32.mrf.mxu1  ;;  %v294_v49 = vadd.f32 %v293_v18, %v240_v2 }
 0x128   : > { %v446_v57 = vadd.f32 %v413_v19, %v375_v11 }
 0x129   : > { %v379_v55 = vadd.f32 %v358_v14, %v294_v49 }
 0x12b   : > { %v427_v21 = vpop.f32.mrf.mxu2 }
 0x12c   : > { %v447_v47 = vadd.f32 %v427_v21, %v376_v44 }
 0x12d   : > { %v555_v29 = vpop.f32.mrf.mxu3 }
 0x12e   : > { %v370_v22 = vpop.f32.mrf.mxu0 }
 0x12f   : > { %v415_v23 = vpop.f32.mrf.mxu1  ;;  %v377_v48 = vadd.f32 %v370_v22, %v306_v9 }
 0x130   : > { %v449_v14 = vadd.f32 %v415_v23, %v1140_v17 }
 0x131   : > { %v448_v53 = vadd.f32 %v441_v20, %v377_v48 }
 0x133   : > { %v429_v24 = vpop.f32.mrf.mxu2 }
 0x134   : > { %v450_v59 = vadd.f32 %v429_v24, %v379_v55 }
 0x135   : > { %v1142_v35 = vpop.f32.mrf.mxu3 }
 0x136   : > { %v372_v26 = vpop.f32.mrf.mxu0 }
 0x137   : > { %v498_v27 = vpop.f32.mrf.mxu1  ;;  %v380_v60 = vadd.f32 %v372_v26, %v308_v15 }
 0x138   : > { %v518_v50 = vadd.f32 %v498_v27, %v447_v47 }
 0x139   : > { %v451_v7 = vadd.f32 %v443_v25, %v380_v60 }
 0x13b   : > { %v512_v28 = vpop.f32.mrf.mxu2 }
 0x13c   : > { %v519_v56 = vadd.f32 %v512_v28, %v448_v53  ;;  %v817_v28 = vpop.permute.xlu1 %816 }
 0x13d   : > { %v640_v39 = vpop.f32.mrf.mxu3 }
 0x13e   : > { %v484_v30 = vpop.f32.mrf.mxu0 }
 0x13f   : > { %v500_v31 = vpop.f32.mrf.mxu1  ;;  %v517_v63 = vadd.f32 %v484_v30, %v446_v57 }
 0x140   : > { %v521_v1 = vadd.f32 %v500_v31, %v450_v59 }
 0x141   : > { %v588_v10 = vadd.f32 %v555_v29, %v517_v63 }
 0x143   : > { %v514_v32 = vpop.f32.mrf.mxu2 }
 0x144   : > { %v522_v11 = vadd.f32 %v514_v32, %v451_v7 }
 0x145   : > { %v642_v45 = vpop.f32.mrf.mxu3 }
 0x146   : > { %v486_v33 = vpop.f32.mrf.mxu0 }
 0x147   : > { %v583_v34 = vpop.f32.mrf.mxu1  ;;  %v520_v21 = vadd.f32 %v486_v33, %v449_v14 }
 0x148   : > { %v590_v61 = vadd.f32 %v583_v34, %v519_v56 }
 0x149   : > { %v591_v31 = vadd.f32 %v1142_v35, %v520_v21 }
 0x14b   : > { %v626_v36 = vpop.f32.mrf.mxu2 }
 0x14c   : > { %v659_v15 = vadd.f32 %v626_v36, %v588_v10 }
 0x14d   : > { %v725_v0 = vpop.f32.mrf.mxu3 }
 0x14e   : > { %v569_v37 = vpop.f32.mrf.mxu0 }
 0x14f   : > { %v585_v38 = vpop.f32.mrf.mxu1  ;;  %v589_v54 = vadd.f32 %v569_v37, %v518_v50 }
 0x150   : > { %v593_v18 = vadd.f32 %v585_v38, %v522_v11 }
 0x151   : > { %v660_v62 = vadd.f32 %v640_v39, %v589_v54 }
 0x153   : > { %v1144_v40 = vpop.f32.mrf.mxu2 }
 0x154   : > { %v662_v36 = vadd.f32 %v1144_v40, %v591_v31 }
 0x155   : > { %v727_v29 = vpop.f32.mrf.mxu3 }
 0x156   : > { %v571_v42 = vpop.f32.mrf.mxu0 }
 0x157   : > { %v697_v43 = vpop.f32.mrf.mxu1  ;;  %v592_v8 = vadd.f32 %v571_v42, %v521_v1 }
 0x158   : > { %v730_v22 = vadd.f32 %v697_v43, %v659_v15 }
 0x159   : > { %v663_v19 = vadd.f32 %v642_v45, %v592_v8 }
 0x15b   : > { %v711_v46 = vpop.f32.mrf.mxu2 }
 0x15c   : > { %v731_v3 = vadd.f32 %v711_v46, %v660_v62 }
 0x15e   : > { %v654_v51 = vpop.f32.mrf.mxu0 }
 0x15f   : > { %v699_v52 = vpop.f32.mrf.mxu1  ;;  %v661_v2 = vadd.f32 %v654_v51, %v590_v61 }
 0x160   : > { %v733_v39 = vadd.f32 %v699_v52, %v662_v36 }
 0x161   : > { %v732_v12 = vadd.f32 %v725_v0, %v661_v2 }
 0x163   : > { %v713_v58 = vpop.f32.mrf.mxu2 }
 0x164   : > { %v734_v24 = vadd.f32 %v713_v58, %v663_v19 }
 0x166   : > { %v656_v4 = vpop.f32.mrf.mxu0 }
 0x167   : > { %v782_v5 = vpop.f32.mrf.mxu1  ;;  %v664_v25 = vadd.f32 %v656_v4, %v593_v18 }
 0x168   : > { %v802_v9 = vadd.f32 %v782_v5, %v731_v3 }
 0x169   : > { %v735_v33 = vadd.f32 %v727_v29, %v664_v25 }
 0x16a   : > { %v820_v13 = vadd.f32 %v812_v6, %v802_v9 }
 0x16b   : > { %v796_v16 = vpop.f32.mrf.mxu2 }
 0x16c   : > { %826 = vst [vmem:[%s1150_s26 + $0x8] sm:$0xff] %v820_v13  ;;  %v803_v20 = vadd.f32 %v796_v16, %v732_v12 }
 0x16e   : > { %v821_v26 = vadd.f32 %v812_v6, %v803_v20  ;;  %v768_v27 = vpop.f32.mrf.mxu0 }
 0x16f   : > { %v801_v30 = vadd.f32 %v768_v27, %v730_v22  ;;  %v784_v17 = vpop.f32.mrf.mxu1 }
 0x170   : > { %828 = vst.msk [vmem:[%s1150_s26 + $0x10] sm:$0xff] %vm827_vm9, %v821_v26  ;;  %v805_v23 = vadd.f32 %v784_v17, %v734_v24 }
 0x171   : > { %v819_v32 = vadd.f32 %v812_v6, %v801_v30 }
 0x172   : > { %v823_v34 = vadd.f32 %v817_v28, %v805_v23 }
 0x173   : > { %825 = vst [vmem:[%s1150_s26] sm:$0xff] %v819_v32  ;;  %v798_v37 = vpop.f32.mrf.mxu2 }
 0x174   : > { %830 = vst [vmem:[%s1150_s26 + $0x20] sm:$0xff] %v823_v34  ;;  %v806_v38 = vadd.f32 %v798_v37, %v735_v33 }
 0x176   : > { %v824_v41 = vadd.f32 %v817_v28, %v806_v38  ;;  %v770_v42 = vpop.f32.mrf.mxu0 }
 0x177   : > { %v804_v43 = vadd.f32 %v770_v42, %v733_v39 }
 0x178   : > { %831 = vst.msk [vmem:[%s1150_s26 + $0x28] sm:$0xff] %vm827_vm9, %v824_v41 }
 0x179   : > { %v822_v44 = vadd.f32 %v817_v28, %v804_v43 }
 0x17b   : > { %829 = vst [vmem:[%s1150_s26 + $0x18] sm:$0xff] %v822_v44 }
 0x17c PF: > { %s13_s12 = sadd.s32 1, %s1026_s12  }
 0x17d   : > { %p10_p4 = scmp.ge.s32.totalorder %s13_s12, 4  }
 0x17f   :  { %12 = sbr.rel (!%p10_p4) target bundleno = 1 (0x1), region = 70 }

</bundles_post_ra>
